<compile_context>
chip_gen: v5e
topology: v5e:2x2
jax: 0.10.0
libtpu: 0.0.40
codegen_flags: <defaults>
</compile_context>

<pallas_src>
import functools

import jax
import jax.numpy as jnp
from jax.experimental import pallas as pl
from jax.experimental.pallas import tpu as pltpu

_LANE = 128            # TPU lane width: pad vocab axis to a multiple of this.
_MAX_TILE_N = 4096     # rows per grid step (working set ~22 MiB incl. temps).
_NEG_INF = -1e30       # finite "minus infinity" for padded vocab columns.


def _round_up(x, m):
    return (x + m - 1) // m * m


def _cdiv(a, b):
    return -(-a // b)


def _tiling(n):
    """Pick (n_pad, tile_n): >=2 tiles (v7x 2 TCs), <=_MAX_TILE_N rows/tile."""
    num_tiles = max(2, _cdiv(n, _MAX_TILE_N))
    tile_n = _round_up(max(_cdiv(n, num_tiles), 8), 8)
    n_pad = _round_up(n, tile_n)
    return n_pad, tile_n


_COMPILER_PARAMS = pltpu.CompilerParams(
    dimension_semantics=("parallel",),
    vmem_limit_bytes=48 * 1024 * 1024,
)


def _make_loss_kernel(n_valid, emit_logits):
    """Kernel: embedding lookup (one-hot @ E on the MXU) + masked per-row NLL.

    If emit_logits is False the logits are never stored (loss-only fast path).
    """

    def kernel(idx_ref, tgt_ref, emb_ref, *out_refs):
        if emit_logits:
            logits_ref, nll_ref = out_refs
        else:
            (nll_ref,) = out_refs

        tn = idx_ref.shape[0]
        v_pad = emb_ref.shape[1]

        idx = idx_ref[...]                                        # (tn, 1) i32
        tgt = tgt_ref[...]                                        # (tn, 1) i32

        col = jax.lax.broadcasted_iota(jnp.int32, (tn, v_pad), 1)  # reused 2x

        one_hot = (col == idx).astype(jnp.float32)                 # (tn, V_pad)
        logits = jnp.dot(one_hot, emb_ref[...],
                         preferred_element_type=jnp.float32,
                         precision=jax.lax.Precision.HIGHEST)      # exact gather
        if emit_logits:
            logits_ref[...] = logits                               # lane-dense vst

        # Cross entropy pieces (mean reduction is done outside the kernel).
        m = jnp.max(logits, axis=-1, keepdims=True)
        lse = m + jnp.log(jnp.sum(jnp.exp(logits - m), axis=-1, keepdims=True))
        true_logit = jnp.sum(jnp.where(col == tgt, logits, 0.0),
                             axis=-1, keepdims=True)               # (tn, 1)

        # Mask padded tail rows so the host-side reduction is a plain sum.
        row = (pl.program_id(0) * tn
               + jax.lax.broadcasted_iota(jnp.int32, (tn, 1), 0))
        nll_ref[...] = jnp.where(row < n_valid, lse - true_logit, 0.0)

    return kernel


def _logits_only_kernel(idx_ref, emb_ref, logits_ref):
    tn, v_pad = logits_ref.shape
    idx = idx_ref[...]
    col = jax.lax.broadcasted_iota(jnp.int32, (tn, v_pad), 1)
    one_hot = (col == idx).astype(jnp.float32)
    logits_ref[...] = jnp.dot(one_hot, emb_ref[...],
                              preferred_element_type=jnp.float32,
                              precision=jax.lax.Precision.HIGHEST)


def _row_spec(tile_n):
    return pl.BlockSpec((tile_n, 1), lambda i: (i, 0))


def _emb_spec(v_pad):
    return pl.BlockSpec((v_pad, v_pad), lambda i: (0, 0))   # table resident


@functools.partial(jax.jit, static_argnames=("vocab_size",))
def _forward_with_loss(idx_flat, tgt_flat, emb_pad, *, vocab_size):
    n = idx_flat.shape[0]
    v_pad = emb_pad.shape[1]
    n_pad, tile_n = _tiling(n)

    idx_p = jnp.pad(idx_flat, (0, n_pad - n)).reshape(n_pad, 1)
    tgt_p = jnp.pad(tgt_flat, (0, n_pad - n)).reshape(n_pad, 1)

    logits_pad, nll_pad = pl.pallas_call(
        _make_loss_kernel(n, emit_logits=True),
        grid=(n_pad // tile_n,),
        in_specs=[_row_spec(tile_n), _row_spec(tile_n), _emb_spec(v_pad)],
        out_specs=(
            pl.BlockSpec((tile_n, v_pad), lambda i: (i, 0)),
            _row_spec(tile_n),
        ),
        out_shape=(
            jax.ShapeDtypeStruct((n_pad, v_pad), jnp.float32),
            jax.ShapeDtypeStruct((n_pad, 1), jnp.float32),
        ),
        compiler_params=_COMPILER_PARAMS,
    )(idx_p, tgt_p, emb_pad)

    loss = jnp.sum(nll_pad) * (1.0 / n)       # padded rows already zeroed
    # PyTorch contract: (B*T, C) logits.  Slice is only paid on this path.
    return logits_pad[:n, :vocab_size], loss


@jax.jit
def _forward_loss_only(idx_flat, tgt_flat, emb_pad):
    """Fast path: never materializes the (N, 128) logits slab."""
    n = idx_flat.shape[0]
    v_pad = emb_pad.shape[1]
    n_pad, tile_n = _tiling(n)

    idx_p = jnp.pad(idx_flat, (0, n_pad - n)).reshape(n_pad, 1)
    tgt_p = jnp.pad(tgt_flat, (0, n_pad - n)).reshape(n_pad, 1)

    nll_pad = pl.pallas_call(
        _make_loss_kernel(n, emit_logits=False),
        grid=(n_pad // tile_n,),
        in_specs=[_row_spec(tile_n), _row_spec(tile_n), _emb_spec(v_pad)],
        out_specs=_row_spec(tile_n),
        out_shape=jax.ShapeDtypeStruct((n_pad, 1), jnp.float32),
        compiler_params=_COMPILER_PARAMS,
    )(idx_p, tgt_p, emb_pad)

    return jnp.sum(nll_pad) * (1.0 / n)


@functools.partial(jax.jit, static_argnames=("vocab_size",))
def _forward_logits(idx_flat, emb_pad, *, vocab_size):
    n = idx_flat.shape[0]
    v_pad = emb_pad.shape[1]
    n_pad, tile_n = _tiling(n)

    idx_p = jnp.pad(idx_flat, (0, n_pad - n)).reshape(n_pad, 1)

    logits_pad = pl.pallas_call(
        _logits_only_kernel,
        grid=(n_pad // tile_n,),
        in_specs=[_row_spec(tile_n), _emb_spec(v_pad)],
        out_specs=pl.BlockSpec((tile_n, v_pad), lambda i: (i, 0)),
        out_shape=jax.ShapeDtypeStruct((n_pad, v_pad), jnp.float32),
        compiler_params=_COMPILER_PARAMS,
    )(idx_p, emb_pad)

    return logits_pad[:n, :vocab_size]


class BigramLanguageModel:
    """JAX/Pallas port of the PyTorch BigramLanguageModel forward pass."""

    def __init__(self, vocab_size, key):
        self.vocab_size = vocab_size
        # nn.Embedding default init is N(0, 1).
        self.token_embedding_table = jax.random.normal(
            key, (vocab_size, vocab_size), dtype=jnp.float32)

        # Lane-padded table: rows >= V are never selected (idx < V), padded
        # columns get a finite -1e30 so the in-kernel log-sum-exp ignores them
        # (and 0 * -1e30 stays finite in the one-hot matmul).
        v_pad = _round_up(vocab_size, _LANE)
        emb_pad = jnp.zeros((v_pad, v_pad), dtype=jnp.float32)
        emb_pad = emb_pad.at[:vocab_size, :vocab_size].set(
            self.token_embedding_table)
        emb_pad = emb_pad.at[:vocab_size, vocab_size:].set(_NEG_INF)
        self._emb_padded = emb_pad

    def forward(self, idx, targets=None, loss_only=False):
        B, T = idx.shape
        idx_flat = idx.reshape(B * T).astype(jnp.int32)
        if targets is not None:
            tgt_flat = targets.reshape(B * T).astype(jnp.int32)
            if loss_only:
                # Training fast path: skip logits materialization entirely.
                loss = _forward_loss_only(idx_flat, tgt_flat, self._emb_padded)
                return None, loss
            logits, loss = _forward_with_loss(
                idx_flat, tgt_flat, self._emb_padded,
                vocab_size=self.vocab_size)
            # PyTorch returns the reshaped (B*T, C) logits when targets given.
            return logits, loss
        else:
            logits = _forward_logits(
                idx_flat, self._emb_padded, vocab_size=self.vocab_size)
            return logits.reshape(B, T, self.vocab_size), None

    def generate(self, idx, max_new_tokens, key):
        # torch.multinomial -> jax.random.categorical (sampling stays outside
        # the kernel; only the logits lookup uses the Pallas path).
        for _ in range(max_new_tokens):
            logits, _ = self.forward(idx, None)
            key, sub = jax.random.split(key)
            nxt = jax.random.categorical(sub, logits[:, -1, :], axis=-1)
            idx = jnp.concatenate([idx, nxt[:, None].astype(idx.dtype)], axis=1)
        return idx


def _reference_forward(idx, targets, emb):
    """Pure-JAX reference for correctness check."""
    logits = emb[idx]                                   # (B, T, V)
    B, T, V = logits.shape
    lf = logits.reshape(B * T, V)
    tf = targets.reshape(B * T)
    lse = jax.scipy.special.logsumexp(lf, axis=-1)
    nll = lse - lf[jnp.arange(B * T), tf]
    return lf, jnp.mean(nll)


if __name__ == "__main__":
    vocab_size = 65   # e.g. tiny-Shakespeare character vocabulary
    B, T = 2, 8

    key = jax.random.PRNGKey(0)
    k_emb, k_idx, k_tgt = jax.random.split(key, 3)

    model = BigramLanguageModel(vocab_size, k_emb)

    idx = jax.random.randint(k_idx, (B, T), 0, vocab_size, dtype=jnp.int32)
    targets = jax.random.randint(k_tgt, (B, T), 0, vocab_size, dtype=jnp.int32)

    # Full path (logits + loss), PyTorch semantics.
    logits, loss = model.forward(idx, targets)
    logits = jax.block_until_ready(logits)
    loss = jax.block_until_ready(loss)

    # Loss-only fast path (no logits writeback).
    _, loss_fast = model.forward(idx, targets, loss_only=True)
    loss_fast = jax.block_until_ready(loss_fast)

    # targets=None path (logits shape (B, T, V)).
    logits_no_tgt, _ = model.forward(idx, None)
    logits_no_tgt = jax.block_until_ready(logits_no_tgt)

    # Verify against pure-JAX reference.
    ref_logits, ref_loss = _reference_forward(idx, targets,
                                              model.token_embedding_table)
    assert logits.shape == (B * T, vocab_size)
    assert logits_no_tgt.shape == (B, T, vocab_size)
    assert jnp.allclose(logits, ref_logits, atol=1e-5)
    assert jnp.allclose(logits_no_tgt.reshape(B * T, vocab_size),
                        ref_logits, atol=1e-5)
    assert jnp.allclose(loss, ref_loss, atol=1e-5)
    assert jnp.allclose(loss_fast, ref_loss, atol=1e-5)

    print("KERNEL_OK")
</pallas_src>

<mosaic_0001>
module attributes {stable_mosaic.version = 11 : i64} {
  func.func @kernel(%arg0: i32, %arg1: memref<8x1xi32, #tpu.memory_space<vmem>>, %arg2: memref<8x1xi32, #tpu.memory_space<vmem>>, %arg3: memref<128x128xf32, #tpu.memory_space<vmem>>, %arg4: memref<8x128xf32, #tpu.memory_space<vmem>>, %arg5: memref<8x1xf32, #tpu.memory_space<vmem>>) attributes {dimension_semantics = [#tpu.dimension_semantics<parallel>], iteration_bounds = array<i64: 2>, scalar_prefetch = 0 : i64, scratch_operands = 0 : i64, tpu.core_type = #tpu.core_type<tc>, window_params = [{transform_indices = @transform_0, window_bounds = array<i64: 8, 1>}, {transform_indices = @transform_1, window_bounds = array<i64: 8, 1>}, {pipeline_mode = #tpu.pipeline_mode<synchronous>, transform_indices = @transform_2, window_bounds = array<i64: 128, 128>}, {transform_indices = @transform_3, window_bounds = array<i64: 8, 128>}, {transform_indices = @transform_4, window_bounds = array<i64: 8, 1>}]} {
    %c0 = arith.constant 0 : index
    %c0_0 = arith.constant 0 : index
    %0 = vector.load %arg1[%c0, %c0_0] : memref<8x1xi32, #tpu.memory_space<vmem>>, vector<8x1xi32>
    %c0_1 = arith.constant 0 : index
    %c0_2 = arith.constant 0 : index
    %1 = vector.load %arg2[%c0_1, %c0_2] : memref<8x1xi32, #tpu.memory_space<vmem>>, vector<8x1xi32>
    %2 = tpu.iota {dimensions = array<i32: 1>} : vector<8x128xi32>
    %3 = vector.broadcast %0 : vector<8x1xi32> to vector<8x128xi32>
    %4 = arith.cmpi eq, %2, %3 : vector<8x128xi32>
    %5 = arith.extui %4 : vector<8x128xi1> to vector<8x128xi32>
    %6 = arith.sitofp %5 : vector<8x128xi32> to vector<8x128xf32>
    %c0_3 = arith.constant 0 : index
    %c0_4 = arith.constant 0 : index
    %7 = vector.load %arg3[%c0_3, %c0_4] : memref<128x128xf32, #tpu.memory_space<vmem>>, vector<128x128xf32>
    %cst = arith.constant dense<0.000000e+00> : vector<8x128xf32>
    %8 = tpu.matmul %6, %7, %cst {dimension_numbers = #tpu.dot_dimension_numbers<[1], [0], [0], [1], [0, 0, 1, 1], [], []>, precision = #tpu.contract_precision<fp32>} : vector<8x128xf32>, vector<128x128xf32>, vector<8x128xf32> -> vector<8x128xf32>
    %c0_5 = arith.constant 0 : index
    %c0_6 = arith.constant 0 : index
    %9 = vector.load %arg4[%c0_5, %c0_6] : memref<8x128xf32, #tpu.memory_space<vmem>>, vector<8x128xf32>
    tpu.vector_store %arg4[%c0_5, %c0_6], %8 {strides = array<i32>} : memref<8x128xf32, #tpu.memory_space<vmem>>, vector<8x128xf32>,
    %cst_7 = arith.constant dense<0xFF800000> : vector<8xf32>
    %10 = vector.multi_reduction <maximumf>, %8, %cst_7 [1] : vector<8x128xf32> to vector<8xf32>
    %11 = vector.shape_cast %10 : vector<8xf32> to vector<8x1xf32>
    %12 = vector.broadcast %11 : vector<8x1xf32> to vector<8x128xf32>
    %13 = arith.subf %8, %12 : vector<8x128xf32>
    %14 = math.exp %13 : vector<8x128xf32>
    %cst_8 = arith.constant dense<0.000000e+00> : vector<8xf32>
    %15 = vector.multi_reduction <add>, %14, %cst_8 [1] : vector<8x128xf32> to vector<8xf32>
    %16 = vector.shape_cast %15 : vector<8xf32> to vector<8x1xf32>
    %17 = math.log %16 : vector<8x1xf32>
    %18 = arith.addf %11, %17 : vector<8x1xf32>
    %19 = vector.broadcast %1 : vector<8x1xi32> to vector<8x128xi32>
    %20 = arith.cmpi eq, %2, %19 : vector<8x128xi32>
    %cst_9 = arith.constant 0.000000e+00 : f32
    %21 = vector.broadcast %cst_9 : f32 to vector<8x128xf32>
    %22 = arith.select %20, %8, %21 : vector<8x128xi1>, vector<8x128xf32>
    %cst_10 = arith.constant dense<0.000000e+00> : vector<8xf32>
    %23 = vector.multi_reduction <add>, %22, %cst_10 [1] : vector<8x128xf32> to vector<8xf32>
    %24 = vector.shape_cast %23 : vector<8xf32> to vector<8x1xf32>
    %c8_i32 = arith.constant 8 : i32
    %25 = arith.muli %arg0, %c8_i32 : i32
    %26 = tpu.iota {dimensions = array<i32: 0>} : vector<8x1xi32>
    %27 = vector.broadcast %25 : i32 to vector<8x1xi32>
    %28 = arith.addi %27, %26 : vector<8x1xi32>
    %c16_i32 = arith.constant 16 : i32
    %29 = vector.broadcast %c16_i32 : i32 to vector<8x1xi32>
    %30 = arith.cmpi slt, %28, %29 : vector<8x1xi32>
    %31 = arith.subf %18, %24 : vector<8x1xf32>
    %cst_11 = arith.constant 0.000000e+00 : f32
    %32 = vector.broadcast %cst_11 : f32 to vector<8x1xf32>
    %33 = arith.select %30, %31, %32 : vector<8x1xi1>, vector<8x1xf32>
    %c0_12 = arith.constant 0 : index
    %c0_13 = arith.constant 0 : index
    %34 = vector.load %arg5[%c0_12, %c0_13] : memref<8x1xf32, #tpu.memory_space<vmem>>, vector<8x1xf32>
    tpu.vector_store %arg5[%c0_12, %c0_13], %33 {strides = array<i32>} : memref<8x1xf32, #tpu.memory_space<vmem>>, vector<8x1xf32>,
    return
  }
  func.func @transform_0(%arg0: i32) -> (i32, i32) {
    %c0_i32 = arith.constant 0 : i32
    %c0_i32_0 = arith.constant 0 : i32
    return %arg0, %c0_i32 : i32, i32
  }
  func.func @transform_1(%arg0: i32) -> (i32, i32) {
    %c0_i32 = arith.constant 0 : i32
    %c0_i32_0 = arith.constant 0 : i32
    return %arg0, %c0_i32 : i32, i32
  }
  func.func @transform_2(%arg0: i32) -> (i32, i32) {
    %c0_i32 = arith.constant 0 : i32
    %c0_i32_0 = arith.constant 0 : i32
    %c0_i32_1 = arith.constant 0 : i32
    return %c0_i32, %c0_i32_0 : i32, i32
  }
  func.func @transform_3(%arg0: i32) -> (i32, i32) {
    %c0_i32 = arith.constant 0 : i32
    %c0_i32_0 = arith.constant 0 : i32
    return %arg0, %c0_i32 : i32, i32
  }
  func.func @transform_4(%arg0: i32) -> (i32, i32) {
    %c0_i32 = arith.constant 0 : i32
    %c0_i32_0 = arith.constant 0 : i32
    return %arg0, %c0_i32 : i32, i32
  }
}

</mosaic_0001>

<bundles_post_ra>
// kernel: _forward_with_loss.1
= control target key start
LH: loop header
LB: loop body
LE: loop exit
PB: predicated region body
PF: predicated region fallthrough
CT: control target
= control target key end

     0   :  { %10 = vsyncpa [#allocation3], 0  ;;  %s1308_s0 = inlined_call_operand.vmem [shape: s32[16,1], index: 0, kind: input, shape index: {}]   ;;  %s1309_s1 = inlined_call_operand.vmem [shape: s32[16,1], index: 1, kind: input, shape index: {}]   ;;  %s1310_s2 = inlined_call_operand.hbm [shape: f32[128,128], index: 2, kind: input, shape index: {}]   ;;  %s1311_s3 = inlined_call_operand.hbm [shape: f32[16,128], index: 3, kind: output, shape index: {0}]   ;;  %s1312_s4 = inlined_call_operand.vmem [shape: f32[16,1], index: 4, kind: output, shape index: {1}]  }
   0x1   :  { %11 = vsyncpa [#allocation4], 0 }
   0x2   :  { %13 = vsyncpa [#allocation4 + $0x1], 0  ;;  %s972_s15 = smov 0   ;;  %s974_s16 = smov 0  }
   0x3   :  { %s976_s17 = smov 0   ;;  %s978_s18 = smov 0  }
   0x4 LB: > { %s993_s19 = sadd.s32 4294967295, %s939_s18   ;;  %s763_s20 = sadd.s32 4294967294, %s939_s18   ;;  %s939_s18 = sphi %s978_s18, %s1318_s18   ;;  %s935_s17 = sphi %s976_s17, %s1317_s17   ;;  %s931_s16 = sphi %s974_s16, %s1316_s16   ;;  %s927_s15 = sphi %s972_s15, %s1315_s15  }
   0x5   : > { %s997_s21 = sadd.s32 1, %s939_s18   ;;  %s99_s22 = sadd.s32 1, %s935_s17 }
   0x6   : > { %s96_s23 = ssub.s32 %s939_s18, %s997_s21  ;;  %p109_p0 = scmp.ne.s32.totalorder %s935_s17, %s931_s16 }
   0x7   : > { %p97_p1 = scmp.eq.s32.totalorder %s96_s23, 0  ;;  %p110_p2 = scmp.eq.s32.totalorder %s993_s19, 1 }
   0x8   : > { %p115_p3 = scmp.ne.s32.totalorder %s931_s16, %s927_s15  ;;  %p116_p4 = scmp.eq.s32.totalorder %s763_s20, 1 }
   0x9   : > { %s1008_s24 = scalar_select %p97_p1, %s935_s17, %s99_s22  }
   0xa   : > { %p1010_p5 = por %p110_p2, %p109_p0  ;;  %p1014_p6 = por %p116_p4, %p115_p3 }
   0xb   : > { %p764_p7 = scmp.ge.s32.totalorder %s939_s18, 1  ;;  %p149_p8 = scmp.lt.s32.totalorder %s939_s18, 3 }
   0xc   : > { %p796_p9 = scmp.eq.s32.totalorder %s993_s19, 0  ;;  %s160_s29 = sshll.u32 %s1310_s2, 4  ;;  %s161_s29 = int_to_ptr.hbm [resolvable:$true] %s160_s29 }
   0xd   : > { %p150_p10 = pnand %p764_p7, %p149_p8  ;;  %s941_s30 = smov [#allocation2]  }
   0xe   : > { %s162_s5 = sshll.u32 %s941_s30, 4  ;;  %s942_s6 = smov 128   ;;  %s163_s5 = int_to_ptr.vmem [resolvable:$true] %s162_s5 }
   0xf   : > { %p788_p11 = pneg %p150_p10  ;;  %s943_s7 = smov 8  }
  0x10   : > { %192 = sbr.rel (%p150_p10) target bundleno = 550 (0x226), region = 32 }
  0x11   : > { %p789_p12 = pnand %p796_p9, %p788_p11 }
  0x13   : > { %791 = dma.hbm_to_vmem [thread:$0]  (!%p789_p12), %s161_s29, 2048, %s163_s5, [#allocation3], %s942_s6, %s942_s6, %s943_s7  }
  0x15   : > { %918 = dma.done.wait (%p796_p9), [#allocation3], 2048  }
  0x16   : > { %920 = vsyncadd (%p796_p9), [#allocation3], 4294965248  ;;  %p226_p13 = scmp.lt.s32.totalorder %s993_s19, 1  ;;  %v944_v0 = vmov 0   ;;  %v263_v2 = vld [vmem:[#allocation2 + $0x78] sm:$0xff]  ;;  %v262_v3 = vld [vmem:[#allocation2 + $0x70] sm:$0xff] }
  0x17   : > { %837 = vset.pattern.permute.xlu0 %v944_v0  ;;  %838 = vset.pattern.permute.xlu1 %v944_v0  ;;  %v1038_v4 = vand.u32 4294901760, %v263_v2  ;;  %v1040_v5 = vand.u32 4294901760, %v262_v3  ;;  %v261_v6 = vld [vmem:[#allocation2 + $0x68] sm:$0xff]  ;;  %v260_v7 = vld [vmem:[#allocation2 + $0x60] sm:$0xff]  ;;  %v259_v8 = vld [vmem:[#allocation2 + $0x58] sm:$0xff]  ;;  %s217_s22 = sand.u32 1, %s931_s16  }
  0x18   : > { %s227_s8 = scalar_select %p226_p13, %s993_s19, 1  ;;  %v1042_v9 = vand.u32 4294901760, %v261_v6  ;;  %v1044_v10 = vand.u32 4294901760, %v260_v7  ;;  %v1046_v11 = vand.u32 4294901760, %v259_v8  ;;  %v258_v12 = vld [vmem:[#allocation2 + $0x50] sm:$0xff]  ;;  %v257_v13 = vld [vmem:[#allocation2 + $0x48] sm:$0xff] }
  0x19   : > { %v256_v14 = vld [vmem:[#allocation2 + $0x40] sm:$0xff]  ;;  %v1049_v15 = vsub.f32 %v263_v2, %v1038_v4  ;;  %v1052_v16 = vsub.f32 %v262_v3, %v1040_v5  ;;  %265 = vmatpush.msra.mxu0 %v1038_v4  ;;  %v1055_v17 = vand.u32 4294901760, %v258_v12  ;;  %v1057_v18 = vand.u32 4294901760, %v257_v13  ;;  %461 = vmatpush.msra.mxu3 %v1038_v4  ;;  %v255_v35 = vld [vmem:[#allocation2 + $0x38] sm:$0xff]  ;;  %v254_v36 = vld [vmem:[#allocation2 + $0x30] sm:$0xff]  ;;  %s769_s23 = sshll.u32 %s217_s22, 3 }
  0x1a   : > { %s1032_s9 = sshll.u32 %s227_s8, 3  ;;  %v1061_v19 = vsub.f32 %v261_v6, %v1042_v9  ;;  %v1064_v20 = vsub.f32 %v260_v7, %v1044_v10  ;;  %v1067_v21 = vsub.f32 %v259_v8, %v1046_v11  ;;  %v1069_v22 = vand.u32 4294901760, %v256_v14  ;;  %v253_v40 = vld [vmem:[#allocation2 + $0x28] sm:$0xff]  ;;  %v252_v42 = vld [vmem:[#allocation2 + $0x20] sm:$0xff]  ;;  %v251_v50 = vld [vmem:[#allocation2 + $0x18] sm:$0xff]  ;;  %s219_s27 = scalar_lea.vmem [#allocation5], %s769_s23 }
  0x1b   : > { %s229_s12 = scalar_lea.vmem %s1308_s0, %s1032_s9  ;;  %v307_v23 = vand.u32 4294901760, %v1049_v15  ;;  %v313_v24 = vand.u32 4294901760, %v1052_v16  ;;  %v1074_v25 = vsub.f32 %v258_v12, %v1055_v17  ;;  %267 = vmatpush.msra.mxu0 %v1040_v5  ;;  %408 = vmatpush.msra.mxu2 %v1049_v15  ;;  %v1081_v28 = vsub.f32 %v257_v13, %v1057_v18  ;;  %v250_v56 = vld [vmem:[#allocation2 + $0x10] sm:$0xff]  ;;  %v249_v62 = vld [vmem:[#allocation2 + $0x8] sm:$0xff]  ;;  %v248_v6 = vld [vmem:[#allocation2] sm:$0xff]  ;;  %s233_s20 = scalar_lea.vmem %s1309_s1, %s1032_s9 }
  0x1c   : > { %v238_v1 = vld [vmem:[%s229_s12] sm:$0xff]  ;;  %v319_v26 = vand.u32 4294901760, %v1061_v19  ;;  %v325_v27 = vand.u32 4294901760, %v1064_v20  ;;  %463 = vmatpush.msra.mxu3 %v1040_v5  ;;  %v331_v31 = vand.u32 4294901760, %v1067_v21  ;;  %v1098_v34 = vsub.f32 %v256_v14, %v1069_v22  ;;  %s777_s28 = sshll.u32 %s993_s19, 3  ;;  %s650_s6 = sshll.u32 %s219_s27, 4  ;;  %s651_s6 = int_to_ptr.vmem [resolvable:$true] %s650_s6 }
  0x1d   : > { %243 = vperm.xlu0 %837, %v238_v1   ;;  %v308_v29 = vsub.f32 %v1049_v15, %v307_v23  ;;  %v314_v30 = vsub.f32 %v1052_v16, %v313_v24  ;;  %269 = vmatpush.msra.mxu0 %v1042_v9  ;;  %v337_v33 = vand.u32 4294901760, %v1074_v25  ;;  %v343_v41 = vand.u32 4294901760, %v1081_v28  ;;  %s648_s5 = scalar_lea.hbm %s1311_s3, %s777_s28  ;;  %s634_s8 = scalar_lea.sflag [#allocation4], %s217_s22 }
  0x1e   : > { %411 = vmatpush.msra.mxu2 %v1052_v16  ;;  %v320_v32 = vsub.f32 %v1061_v19, %v319_v26  ;;  %465 = vmatpush.msra.mxu3 %v1042_v9  ;;  %v326_v39 = vsub.f32 %v1064_v20, %v325_v27  ;;  %v332_v44 = vsub.f32 %v1067_v21, %v331_v31  ;;  %v1111_v45 = vand.u32 4294901760, %v255_v35  ;;  %s652_s7 = sshll.u32 %s648_s5, 4  ;;  %s893_s13 = scalar_lea.hbm %s1311_s3, 16  ;;  %s653_s7 = int_to_ptr.hbm [resolvable:$true] %s652_s7 }
  0x1f   : > { %v309_v37 = vand.u32 4294901760, %v308_v29  ;;  %v315_v38 = vand.u32 4294901760, %v314_v30  ;;  %271 = vmatpush.msra.mxu0 %v1044_v10  ;;  %v1114_v46 = vand.u32 4294901760, %v254_v36  ;;  %v338_v47 = vsub.f32 %v1074_v25, %v337_v33  ;;  %s887_s10 = sshra.s32 %s653_s7, 4  ;;  %s888_s10 = int_to_ptr.hbm [resolvable:$true] %s887_s10 }
  0x20   : > { %414 = vmatpush.msra.mxu2 %v1061_v19  ;;  %467 = vmatpush.msra.mxu3 %v1044_v10  ;;  %v321_v43 = vand.u32 4294901760, %v320_v32  ;;  %v349_v48 = vand.u32 4294901760, %v1098_v34  ;;  %v1120_v49 = vand.u32 4294901760, %v253_v40  ;;  %v327_v51 = vand.u32 4294901760, %v326_v39  ;;  %s889_s11 = scalar_lea.hbm %s888_s10, 8  ;;  %p894_p3 = scmp.lt.s32.totalorder %s888_s10, %s1311_s3 }
  0x21   : > { %310 = vmatpush.msra.mxu1 %v309_v37  ;;  %273 = vmatpush.msra.mxu0 %v1046_v11  ;;  %v1125_v52 = vsub.f32 %v255_v35, %v1111_v45  ;;  %v1128_v53 = vsub.f32 %v254_v36, %v1114_v46  ;;  %v1131_v54 = vand.u32 4294901760, %v252_v42  ;;  %v344_v55 = vsub.f32 %v1081_v28, %v343_v41  ;;  %p890_p0 = scmp.ne.s32.totalorder %s888_s10, %s889_s11  ;;  %p895_p4 = scmp.lt.s32.totalorder %s893_s13, %s889_s11 }
  0x22   : > { %417 = vmatpush.msra.mxu2 %v1064_v20  ;;  %469 = vmatpush.msra.mxu3 %v1046_v11  ;;  %v333_v57 = vand.u32 4294901760, %v332_v44  ;;  %v1140_v59 = vsub.f32 %v253_v40, %v1120_v49  ;;  %v1143_v60 = vand.u32 4294901760, %v251_v50  ;;  %v350_v61 = vsub.f32 %v1098_v34, %v349_v48 }
  0x23   : > { %316 = vmatpush.msra.mxu1 %v315_v38  ;;  %275 = vmatpush.msra.mxu0 %v1055_v17  ;;  %v355_v58 = vand.u32 4294901760, %v1125_v52  ;;  %v339_v63 = vand.u32 4294901760, %v338_v47  ;;  %v361_v0 = vand.u32 4294901760, %v1128_v53  ;;  %v1152_v1 = vsub.f32 %v252_v42, %v1131_v54  ;;  %p891_p1 = pnand %p890_p0, %p1010_p5  ;;  %p896_p7 = por %p895_p4, %p894_p3 }
  0x24   : > { %420 = vmatpush.msra.mxu2 %v1067_v21  ;;  %471 = vmatpush.msra.mxu3 %v1055_v17  ;;  %v1155_v2 = vand.u32 4294901760, %v250_v56  ;;  %v345_v3 = vand.u32 4294901760, %v344_v55  ;;  %v367_v8 = vand.u32 4294901760, %v1140_v59  ;;  %v1164_v12 = vsub.f32 %v251_v50, %v1143_v60 }
  0x25   : > { %322 = vmatpush.msra.mxu1 %v321_v43  ;;  %277 = vmatpush.msra.mxu0 %v1057_v18  ;;  %v356_v7 = vsub.f32 %v1125_v52, %v355_v58  ;;  %v1167_v13 = vand.u32 4294901760, %v249_v62  ;;  %v351_v14 = vand.u32 4294901760, %v350_v61  ;;  %v362_v29 = vsub.f32 %v1128_v53, %v361_v0  ;;  %p892_p2 = pneg %p891_p1 }
  0x26   : > { %423 = vmatpush.msra.mxu2 %v1074_v25  ;;  %473 = vmatpush.msra.mxu3 %v1057_v18  ;;  %v373_v30 = vand.u32 4294901760, %v1152_v1  ;;  %v1176_v32 = vsub.f32 %v250_v56, %v1155_v2  ;;  %v1179_v35 = vand.u32 4294901760, %v248_v6  ;;  %v368_v37 = vsub.f32 %v1140_v59, %v367_v8 }
  0x27   : > { %328 = vmatpush.msra.mxu1 %v327_v51  ;;  %279 = vmatpush.msra.mxu0 %v1069_v22  ;;  %v357_v36 = vand.u32 4294901760, %v356_v7  ;;  %v379_v38 = vand.u32 4294901760, %v1164_v12  ;;  %v1188_v39 = vsub.f32 %v249_v62, %v1167_v13  ;;  %v363_v40 = vand.u32 4294901760, %v362_v29  ;;  %p897_p8 = pnand %p896_p7, %p892_p2 }
  0x28   : > { %426 = vmatpush.msra.mxu2 %v1081_v28  ;;  %475 = vmatpush.msra.mxu3 %v1069_v22  ;;  %v374_v42 = vsub.f32 %v1152_v1, %v373_v30  ;;  %v385_v43 = vand.u32 4294901760, %v1176_v32  ;;  %v1198_v44 = vsub.f32 %v248_v6, %v1179_v35  ;;  %v369_v47 = vand.u32 4294901760, %v368_v37 }
  0x29   : > { %334 = vmatpush.msra.mxu1 %v333_v57  ;;  %281 = vmatpush.msra.mxu0 %v1111_v45  ;;  %v380_v50 = vsub.f32 %v1164_v12, %v379_v38  ;;  %v391_v51 = vand.u32 4294901760, %v1188_v39  ;;  %v946_v15 = vmov 0.0  }
  0x2a   : > { %429 = vmatpush.msra.mxu2 %v1098_v34  ;;  %477 = vmatpush.msra.mxu3 %v1111_v45  ;;  %v375_v55 = vand.u32 4294901760, %v374_v42  ;;  %v386_v56 = vsub.f32 %v1176_v32, %v385_v43  ;;  %v397_v57 = vand.u32 4294901760, %v1198_v44 }
  0x2b   : > { %340 = vmatpush.msra.mxu1 %v339_v63  ;;  %283 = vmatpush.msra.mxu0 %v1114_v46  ;;  %v381_v61 = vand.u32 4294901760, %v380_v50  ;;  %v392_v62 = vsub.f32 %v1188_v39, %v391_v51 }
  0x2c   : > { %432 = vmatpush.msra.mxu2 %v1125_v52  ;;  %479 = vmatpush.msra.mxu3 %v1114_v46  ;;  %v387_v63 = vand.u32 4294901760, %v386_v56 }
  0x2d   : > { %346 = vmatpush.msra.mxu1 %v345_v3  ;;  %285 = vmatpush.msra.mxu0 %v1120_v49  ;;  %v398_v3 = vsub.f32 %v1198_v44, %v397_v57  ;;  %v393_v6 = vand.u32 4294901760, %v392_v62 }
  0x2e   : > { %435 = vmatpush.msra.mxu2 %v1128_v53  ;;  %481 = vmatpush.msra.mxu3 %v1120_v49 }
  0x2f   : > { %352 = vmatpush.msra.mxu1 %v351_v14  ;;  %287 = vmatpush.msra.mxu0 %v1131_v54  ;;  %v399_v7 = vand.u32 4294901760, %v398_v3 }
  0x30   : > { %438 = vmatpush.msra.mxu2 %v1140_v59  ;;  %483 = vmatpush.msra.mxu3 %v1131_v54 }
  0x31   : > { %358 = vmatpush.msra.mxu1 %v357_v36  ;;  %289 = vmatpush.msra.mxu0 %v1143_v60 }
  0x32   : > { %441 = vmatpush.msra.mxu2 %v1152_v1  ;;  %485 = vmatpush.msra.mxu3 %v1143_v60 }
  0x33   : > { %364 = vmatpush.msra.mxu1 %v363_v40  ;;  %291 = vmatpush.msra.mxu0 %v1155_v2 }
  0x34   : > { %444 = vmatpush.msra.mxu2 %v1164_v12  ;;  %487 = vmatpush.msra.mxu3 %v1155_v2 }
  0x35   : > { %370 = vmatpush.msra.mxu1 %v369_v47  ;;  %293 = vmatpush.msra.mxu0 %v1167_v13 }
  0x36   : > { %447 = vmatpush.msra.mxu2 %v1176_v32  ;;  %489 = vmatpush.msra.mxu3 %v1167_v13 }
  0x37   : > { %376 = vmatpush.msra.mxu1 %v375_v55  ;;  %295 = vmatpush.msra.mxu0 %v1179_v35 }
  0x38   : > { %450 = vmatpush.msra.mxu2 %v1188_v39  ;;  %491 = vmatpush.msra.mxu3 %v1179_v35 }
  0x39   : > { %502 = vmatpush.msrb.mxu0 %v307_v23  ;;  %382 = vmatpush.msra.mxu1 %v381_v61 }
  0x3a   : > { %453 = vmatpush.msra.mxu2 %v1198_v44 }
  0x3b   : > { %506 = vmatpush.msrb.mxu0 %v313_v24  ;;  %388 = vmatpush.msra.mxu1 %v387_v63 }
  0x3d   : > { %510 = vmatpush.msrb.mxu0 %v319_v26  ;;  %394 = vmatpush.msra.mxu1 %v393_v6 }
  0x3f   : > { %514 = vmatpush.msrb.mxu0 %v325_v27  ;;  %400 = vmatpush.msra.mxu1 %v399_v7 }
  0x41   : > { %569 = vmatpush.msrb.mxu1 %v1038_v4  ;;  %518 = vmatpush.msrb.mxu0 %v331_v31  ;;  %v239_v4 = vld [vmem:[%s233_s20] sm:$0xff] }
  0x42   : > { %617 = vperm.xlu1 %838, %v239_v4  }
  0x43   : > { %571 = vmatpush.msrb.mxu1 %v1040_v5  ;;  %522 = vmatpush.msrb.mxu0 %v337_v33  ;;  %v240_v5 = vlaneseq }
  0x45   : > { %573 = vmatpush.msrb.mxu1 %v1042_v9  ;;  %526 = vmatpush.msrb.mxu0 %v343_v41  ;;  %v241_v9 = vand.u32 127, %v240_v5 }
  0x47   : > { %575 = vmatpush.msrb.mxu1 %v1044_v10  ;;  %530 = vmatpush.msrb.mxu0 %v349_v48 }
  0x49   : > { %577 = vmatpush.msrb.mxu1 %v1046_v11  ;;  %534 = vmatpush.msrb.mxu0 %v355_v58  ;;  %v945_v11 = vmov 1.0  }
  0x4b   : > { %579 = vmatpush.msrb.mxu1 %v1055_v17  ;;  %538 = vmatpush.msrb.mxu0 %v361_v0 }
  0x4d   : > { %581 = vmatpush.msrb.mxu1 %v1057_v18  ;;  %542 = vmatpush.msrb.mxu0 %v367_v8 }
  0x4f   : > { %583 = vmatpush.msrb.mxu1 %v1069_v22  ;;  %546 = vmatpush.msrb.mxu0 %v373_v30 }
  0x51   : > { %585 = vmatpush.msrb.mxu1 %v1111_v45  ;;  %550 = vmatpush.msrb.mxu0 %v379_v38 }
  0x53   : > { %587 = vmatpush.msrb.mxu1 %v1114_v46  ;;  %554 = vmatpush.msrb.mxu0 %v385_v43 }
  0x55   : > { %589 = vmatpush.msrb.mxu1 %v1120_v49  ;;  %558 = vmatpush.msrb.mxu0 %v391_v51 }
  0x57   : > { %591 = vmatpush.msrb.mxu1 %v1131_v54  ;;  %562 = vmatpush.msrb.mxu0 %v397_v57 }
  0x59   : > { %593 = vmatpush.msrb.mxu1 %v1143_v60 }
  0x5b   : > { %595 = vmatpush.msrb.mxu1 %v1155_v2 }
  0x5d   : > { %597 = vmatpush.msrb.mxu1 %v1167_v13 }
  0x5f   : > { %599 = vmatpush.msrb.mxu1 %v1179_v35 }
  0x8f   : > { %v244_v10 = vpop.permute.xlu0 %243 }
  0x90   : > { %vm245_vm0 = vcmp.eq.s32.totalorder %v241_v9, %v244_v10 }
  0x91   : > { %774 = vmatmul.msk.f32.vlgmr.msra.gmra.mxu1 %vm245_vm0, %v945_v11  ;;  %v773_v16 = vsel %vm245_vm0, 1.0, %v946_v15 }
  0x92   : > { %v297_v17 = vsub.f32 %v773_v16, %v773_v16 }
  0x94   : > { %456 = vmatmul.f32.vlgmr.msra.gmra.mxu2 %v297_v17  ;;  %v298_v18 = vand.u32 4294901760, %v297_v17 }
  0x96   : > { %495 = vmatmul.f32.vlgmr.msra.gmra.mxu3 %v298_v18  ;;  %v299_v19 = vsub.f32 %v297_v17, %v298_v18 }
  0x98   : > { %v300_v20 = vand.u32 4294901760, %v299_v19 }
  0x99   : > { %776 = vmatmul.msk.f32.vlgmr.msrb.gmra.mxu1 %vm245_vm0, %v945_v11 }
  0x9a   : > { %301 = vmatmul.f32.vlgmr.msra.gmra.mxu0 %v300_v20 }
  0xa2   : > { %775 = vmatmul.msk.f32.vlgmr.msrb.gmra.mxu0 %vm245_vm0, %v945_v11 }
  0xb4   : > { %v618_v28 = vpop.permute.xlu1 %617 }
  0xb5   : > { %vm619_vm1 = vcmp.eq.s32.totalorder %v241_v9, %v618_v28 }
 0x10e   : > { %v403_v21 = vpop.f32.mrf.mxu1 }
 0x116   : > { %v602_v34 = vpop.f32.mrf.mxu1 }
 0x117   : > { %v302_v22 = vpop.f32.mrf.mxu0  ;;  %v457_v24 = vpop.f32.mrf.mxu2 }
 0x118   : > { %v404_v23 = vadd.f32 %v403_v21, %v302_v22 }
 0x119   : > { %v496_v26 = vpop.f32.mrf.mxu3 }
 0x11a   : > { %v458_v25 = vadd.f32 %v457_v24, %v404_v23 }
 0x11c   : > { %v497_v27 = vadd.f32 %v496_v26, %v458_v25 }
 0x11f   : > { %v565_v31 = vpop.f32.mrf.mxu0 }
 0x120   : > { %v566_v33 = vadd.f32 %v565_v31, %v497_v27 }
 0x122   : > { %v603_v41 = vadd.f32 %v602_v34, %v566_v33 }
 0x124   : > { %606 = vmax.xlane.f32.xlu0 %v603_v41  ;;  %v620_v45 = vsel %vm619_vm1, %v603_v41, 0.0  ;;  %605 = vst [vmem:[%s219_s27] sm:$0xff] %v603_v41 }
 0x125   : > { %621 = vadd.xlane.f32.xlu2 %v620_v45 }
 0x197   : > { %v607_v46 = vpop.xlane.xlu0 %606 }
 0x198   : > { %v608_v48 = vsub.f32 %v603_v41, %v607_v46 }
 0x19a   : > { %v609_v49 = vmul.f32 1.442695, %v608_v48 }
 0x19c   : > { %839 = vpow2.f32 %v609_v49 }
 0x1a2   : > { %v840_v52 = vpop.eup %839 }
 0x1a3   : > { %611 = vadd.xlane.f32.xlu1 %v840_v52 }
 0x1a4   : > { %900 = shalt.err (!%p897_p8)
}
 0x1a5   : > { %786 = dma.vmem_to_hbm [thread:$0]  (%p1010_p5), %s651_s6, 128, %s653_s7, %s634_s8   ;;  %v625_v54 = vshrl.u32 %v240_v5, 7  ;;  %v626_v58 = vstv %s777_s28  ;;  %v622_v2 = vpop.xlane.xlu2 %621  ;;  %vm631_vm3 = vcmask 7168  }
 0x1a6   : > { %s237_s27 = scalar_lea.vmem %s1312_s4, %s1032_s9 }
 0x1a7   : > { %v627_v60 = vadd.s32 %v626_v58, %v625_v54 }
 0x1a9   : > { %vm628_vm2 = vcmp.lt.s32.totalorder %v627_v60, 16 }
 0x216   : > { %v612_v53 = vpop.xlane.xlu1 %611 }
 0x217   : > { %841 = vlog2.f32 %v612_v53 }
 0x21d   : > { %v842_v59 = vpop.eup %841 }
 0x21e   : > { %v614_v0 = vmul.f32 0.6931472, %v842_v59 }
 0x220   : > { %v615_v1 = vadd.f32 %v614_v0, %v607_v46 }
 0x222   : > { %v629_v8 = vsub.f32 %v615_v1, %v622_v2 }
 0x224   : > { %v630_v12 = vsel %vm628_vm2, %v629_v8, 0.0 }
 0x225   : > { %632 = vst.msk [vmem:[%s237_s27] sm:$0xff] %vm631_vm3, %v630_v12 }
 0x226 PF: > { %p798_p5 = scmp.ge.s32.totalorder %s939_s18, 2  ;;  %s667_s25 = sand.u32 1, %s927_s15  }
 0x227   : > { %s668_s28 = scalar_lea.sflag [#allocation4], %s667_s25 }
 0x228   : > { %p793_p9 = pnand %p798_p5, %p1014_p6 }
 0x22a   : > { %p794_p10 = pneg %p793_p9 }
 0x22c   : > { %922 = dma.done.wait (%p794_p10), %s668_s28, 128  }
 0x22d   : > { %924 = vsyncadd (%p794_p10), %s668_s28, 4294967168  ;;  %p16_p11 = scmp.ge.s32.totalorder %s997_s21, 4   ;;  %s1315_s15 = smov %s931_s16 }
 0x22e   : > { %s1316_s16 = smov %s935_s17  ;;  %s1317_s17 = smov %s1008_s24 }
 0x22f   : > { %s1318_s18 = smov %s997_s21  ;;  %18 = sbr.rel (!%p16_p11) target bundleno = 4 (0x4), region = 87 }
 0x234   :  { %681 = vsyncpa [#allocation3], 1 }
 0x235   :  { %683 = vsyncpa [#allocation3 + $0x1], 1 }
 0x236   :  { %684 = vsyncpa [#allocation4], 1 }
 0x237   :  { %686 = vsyncpa [#allocation4 + $0x1], 1 }

</bundles_post_ra>
